<compile_context>
chip_gen: v7x
topology: tpu7x:2x2x1
jax: 0.10.0
libtpu: 0.0.40
codegen_flags: <defaults>
</compile_context>

<pallas_src>
import functools
import math

import jax
import jax.numpy as jnp
from jax.experimental import pallas as pl
from jax.experimental.pallas import tpu as pltpu


def _round_up(x: int, n: int) -> int:
    return ((x + n - 1) // n) * n


def _wsum_kernel(x_ref, w_ref, b_ref, o_ref, *, contract_rhs_dim: int):
    # One MXU matmul of the streamed X tile against the VMEM-resident weight,
    # plus a broadcast bias add.  contract_rhs_dim=1 contracts against the
    # untransposed (dim, n_elements) weight; =0 against the packed (K, N) one.
    acc = jax.lax.dot_general(
        x_ref[...],
        w_ref[...],
        dimension_numbers=(((1,), (contract_rhs_dim,)), ((), ())),
        preferred_element_type=jnp.float32,
    )
    o_ref[...] = (acc + b_ref[...]).astype(o_ref.dtype)


def _launch(x2d, w2d, b2d, *, tm, contract_rhs_dim, flops, bytes_accessed):
    m, k = x2d.shape
    n = b2d.shape[-1]
    grid = (pl.cdiv(m, tm),)
    return pl.pallas_call(
        functools.partial(_wsum_kernel, contract_rhs_dim=contract_rhs_dim),
        out_shape=jax.ShapeDtypeStruct((m, n), x2d.dtype),
        grid_spec=pltpu.PrefetchScalarGridSpec(
            num_scalar_prefetch=0,
            grid=grid,
            in_specs=[
                pl.BlockSpec((tm, k), lambda i: (i, 0)),    # streamed X tiles
                pl.BlockSpec(w2d.shape, lambda i: (0, 0)),  # weight: VMEM-resident
                pl.BlockSpec((1, n), lambda i: (0, 0)),     # bias: VMEM-resident
            ],
            out_specs=pl.BlockSpec((tm, n), lambda i: (i, 0)),
        ),
        compiler_params=pltpu.CompilerParams(
            # Independent output tiles -> megacore sharding on v7x.
            dimension_semantics=("parallel",),
        ),
        cost_estimate=pl.CostEstimate(
            flops=flops, transcendentals=0, bytes_accessed=bytes_accessed
        ),
    )(x2d, w2d, b2d)


def weighted_sum_embedding(weights: jax.Array, w: jax.Array, b: jax.Array,
                           *, block_tokens: int = 8192) -> jax.Array:
    """out[..., d] = sum_k weights[..., k] * w[d, k] + b[d].

    weights: (..., n_elements); w: (dim, n_elements); b: (dim,).
    """
    *lead, n_elements = weights.shape
    dim = w.shape[0]
    m = int(math.prod(lead)) if lead else 1

    x2d = weights.reshape(m, n_elements)
    itemsize = jnp.dtype(weights.dtype).itemsize
    flops = 2 * m * n_elements * dim
    bytes_accessed = (
        itemsize * (m * n_elements + m * dim)
        + int(w.size) * jnp.dtype(w.dtype).itemsize
        + int(b.size) * jnp.dtype(b.dtype).itemsize
    )

    # Lane-dense packing factor: fuse `pack` tokens per row so both X loads and
    # output stores are full 128-lane accesses (vreg is 8x128 on v5e/v6e/v7x).
    pack = 1
    if (0 < n_elements < 128 and 0 < dim < 128
            and 128 % n_elements == 0 and 128 % dim == 0):
        pack = math.lcm(128 // n_elements, 128 // dim)

    if pack > 1:
        m_pad = _round_up(max(m, 1), pack)
        if m_pad != m:
            x2d = jnp.pad(x2d, ((0, m_pad - m), (0, 0)))
        mp = m_pad // pack
        kp, np_ = pack * n_elements, pack * dim
        xp = x2d.reshape(mp, kp)                              # pack tokens per row
        wp = jnp.kron(jnp.eye(pack, dtype=w.dtype), w.T)      # block-diag (kp, np_)
        bp = jnp.tile(b, pack).reshape(1, np_)
        tm = min(max(_round_up(block_tokens // pack, 8), 8), _round_up(mp, 8))
        outp = _launch(xp, wp, bp, tm=tm, contract_rhs_dim=0,
                       flops=flops, bytes_accessed=bytes_accessed)
        out2d = outp.reshape(m_pad, dim)[:m]
    else:
        # General fallback: contract X's last axis against w's last axis
        # directly (MXU handles the transposed operand natively).
        b2d = b.reshape(1, dim)
        tm = min(max(_round_up(block_tokens, 8), 8), _round_up(max(m, 1), 8))
        out2d = _launch(x2d, w, b2d, tm=tm, contract_rhs_dim=1,
                        flops=flops, bytes_accessed=bytes_accessed)

    return out2d.reshape(*lead, dim)


if __name__ == "__main__":
    # Module-consistent small shapes: seq_len=8, batch=2, n_elements=32, dim=32.
    seq_len, batch, n_elements, dim = 8, 2, 32, 32

    key = jax.random.PRNGKey(0)
    k_w, k_b, k_x = jax.random.split(key, 3)

    # Deterministic nn.Linear-style init: U(-1/sqrt(in), 1/sqrt(in)).
    bound = 1.0 / math.sqrt(n_elements)
    w = jax.random.uniform(k_w, (dim, n_elements), jnp.float32, -bound, bound)
    b = jax.random.uniform(k_b, (dim,), jnp.float32, -bound, bound)
    weights = jax.random.uniform(k_x, (seq_len, batch, n_elements), jnp.float32)

    out = jax.block_until_ready(weighted_sum_embedding(weights, w, b))
    ref = weights @ w.T + b
    assert out.shape == (seq_len, batch, dim)
    assert jnp.allclose(out, ref, atol=1e-5, rtol=1e-5)

    # Also exercise the general (non-packed) fallback path with shapes that
    # don't divide 128 evenly.
    n2, d2 = 48, 64
    k_w2, k_b2, k_x2 = jax.random.split(jax.random.PRNGKey(1), 3)
    bound2 = 1.0 / math.sqrt(n2)
    w2 = jax.random.uniform(k_w2, (d2, n2), jnp.float32, -bound2, bound2)
    b2 = jax.random.uniform(k_b2, (d2,), jnp.float32, -bound2, bound2)
    x2 = jax.random.uniform(k_x2, (seq_len, batch, n2), jnp.float32)
    out2 = jax.block_until_ready(weighted_sum_embedding(x2, w2, b2))
    ref2 = x2 @ w2.T + b2
    assert out2.shape == (seq_len, batch, d2)
    assert jnp.allclose(out2, ref2, atol=1e-5, rtol=1e-5)

    print("KERNEL_OK")
</pallas_src>

<mosaic_0001>
module attributes {stable_mosaic.version = 11 : i64} {
  func.func @_wsum_kernel(%arg0: i32, %arg1: memref<8x128xf32, #tpu.memory_space<vmem>>, %arg2: memref<128x128xf32, #tpu.memory_space<vmem>>, %arg3: memref<1x128xf32, #tpu.memory_space<vmem>>, %arg4: memref<8x128xf32, #tpu.memory_space<vmem>>) attributes {dimension_semantics = [#tpu.dimension_semantics<parallel>], iteration_bounds = array<i64: 1>, scalar_prefetch = 0 : i64, scratch_operands = 0 : i64, tpu.core_type = #tpu.core_type<tc>, window_params = [{transform_indices = @transform_0, window_bounds = array<i64: 8, 128>}, {pipeline_mode = #tpu.pipeline_mode<synchronous>, transform_indices = @transform_1, window_bounds = array<i64: 128, 128>}, {pipeline_mode = #tpu.pipeline_mode<synchronous>, transform_indices = @transform_2, window_bounds = array<i64: 1, 128>}, {transform_indices = @transform_3, window_bounds = array<i64: 8, 128>}]} {
    %c0 = arith.constant 0 : index
    %c0_0 = arith.constant 0 : index
    %0 = vector.load %arg1[%c0, %c0_0] : memref<8x128xf32, #tpu.memory_space<vmem>>, vector<8x128xf32>
    %c0_1 = arith.constant 0 : index
    %c0_2 = arith.constant 0 : index
    %1 = vector.load %arg2[%c0_1, %c0_2] : memref<128x128xf32, #tpu.memory_space<vmem>>, vector<128x128xf32>
    %cst = arith.constant dense<0.000000e+00> : vector<8x128xf32>
    %2 = tpu.matmul %0, %1, %cst {dimension_numbers = #tpu.dot_dimension_numbers<[1], [0], [0], [1], [0, 0, 1, 1], [], []>} : vector<8x128xf32>, vector<128x128xf32>, vector<8x128xf32> -> vector<8x128xf32>
    %c0_3 = arith.constant 0 : index
    %c0_4 = arith.constant 0 : index
    %3 = vector.load %arg3[%c0_3, %c0_4] : memref<1x128xf32, #tpu.memory_space<vmem>>, vector<1x128xf32>
    %4 = vector.broadcast %3 : vector<1x128xf32> to vector<8x128xf32>
    %5 = arith.addf %2, %4 : vector<8x128xf32>
    %c0_5 = arith.constant 0 : index
    %c0_6 = arith.constant 0 : index
    %6 = vector.load %arg4[%c0_5, %c0_6] : memref<8x128xf32, #tpu.memory_space<vmem>>, vector<8x128xf32>
    tpu.vector_store %arg4[%c0_5, %c0_6], %5 {strides = array<i32>} : memref<8x128xf32, #tpu.memory_space<vmem>>, vector<8x128xf32>,
    return
  }
  func.func @transform_0(%arg0: i32) -> (i32, i32) {
    %c0_i32 = arith.constant 0 : i32
    %c0_i32_0 = arith.constant 0 : i32
    return %arg0, %c0_i32 : i32, i32
  }
  func.func @transform_1(%arg0: i32) -> (i32, i32) {
    %c0_i32 = arith.constant 0 : i32
    %c0_i32_0 = arith.constant 0 : i32
    %c0_i32_1 = arith.constant 0 : i32
    return %c0_i32, %c0_i32_0 : i32, i32
  }
  func.func @transform_2(%arg0: i32) -> (i32, i32) {
    %c0_i32 = arith.constant 0 : i32
    %c0_i32_0 = arith.constant 0 : i32
    %c0_i32_1 = arith.constant 0 : i32
    return %c0_i32, %c0_i32_0 : i32, i32
  }
  func.func @transform_3(%arg0: i32) -> (i32, i32) {
    %c0_i32 = arith.constant 0 : i32
    %c0_i32_0 = arith.constant 0 : i32
    return %arg0, %c0_i32 : i32, i32
  }
}

</mosaic_0001>

<bundles_post_ra>
// kernel: tpu_custom_call.1
= control target key start
LH: loop header
LB: loop body
LE: loop exit
PB: predicated region body
PF: predicated region fallthrough
CT: control target
= control target key end

     0   :  { %8 = vsyncpa [#allocation3], 0  ;;  %s390_s0 = inlined_call_operand.hbm [shape: f32[4,128], index: 0, kind: input, shape index: {}]   ;;  %s391_s1 = inlined_call_operand.hbm [shape: f32[128,128], index: 1, kind: input, shape index: {}]   ;;  %s392_s2 = inlined_call_operand.vmem [shape: f32[1,128], index: 2, kind: input, shape index: {}]   ;;  %s393_s3 = inlined_call_operand.hbm [shape: f32[4,128], index: 3, kind: output, shape index: {}]  }
   0x1   :  { %9 = vsyncpa [#allocation6], 0 }
   0x2   :  { %10 = vsyncpa [#allocation4], 0 }
   0x3   :  { %15 = vsyncadd [#allocation3], 64  ;;  %s315_s12 = smov [#allocation2]   ;;  %s243_s16 = scalar_lea.hbm %s390_s0, 64 }
   0x4   :  { %s16_s13 = sshll.u32 %s315_s12, 4  ;;  %p244_p0 = scmp.ne.s32.totalorder %s390_s0, %s243_s16  ;;  %s17_s13 = int_to_ptr.vmem [resolvable:$true] %s16_s13 }
   0x5   :  { %p247_p1 = scmp.lt.u32.totalorder %s243_s16, %s390_s0 }
   0x7   :  { %p249_p2 = pnand %p247_p1, %p244_p0 }
   0x9   :  { %252 = shalt.err (!%p249_p2)
}
   0xa   :  { %s253_s21 = scalar_lea.vmem %s17_s13, 64  ;;  %s257_s22 = scalar_lea.vmem %s17_s13, 128 }
   0xb   :  { %p254_p3 = scmp.ne.s32.totalorder %s17_s13, %s253_s21  ;;  %p258_p4 = scmp.lt.s32.totalorder %s17_s13, %s17_s13 }
   0xc   :  { %p259_p5 = scmp.lt.s32.totalorder %s257_s22, %s253_s21 }
   0xe   :  { %p260_p6 = por %p259_p5, %p258_p4 }
  0x10   :  { %p261_p7 = pnand %p260_p6, %p254_p3 }
  0x12   :  { %264 = shalt.err (!%p261_p7)
}
  0x13   :  { %s316_s23 = smov 64   ;;  %s317_s24 = smov 4  }
  0x14   :  { %22 = dma.hbm_to_vmem [thread:$0]  %s390_s0, 64, %s17_s13, [#allocation3], %s316_s23, %s316_s23, %s317_s24  }
  0x15   :  { %s318_s27 = smov [#allocation5]   ;;  %s265_s4 = scalar_lea.hbm %s391_s1, 2048 }
  0x16   :  { %s28_s28 = sshll.u32 %s318_s27, 4  ;;  %p266_p8 = scmp.ne.s32.totalorder %s391_s1, %s265_s4  ;;  %s29_s28 = int_to_ptr.vmem [resolvable:$true] %s28_s28 }
  0x17   :  { %p269_p9 = scmp.lt.u32.totalorder %s265_s4, %s391_s1 }
  0x19   :  { %p271_p10 = pnand %p269_p9, %p266_p8 }
  0x1b   :  { %274 = shalt.err (!%p271_p10)
}
  0x1c   :  { %s275_s9 = scalar_lea.vmem %s29_s28, 2048  ;;  %p280_p12 = scmp.lt.s32.totalorder %s29_s28, %s29_s28 }
  0x1d   :  { %p276_p11 = scmp.ne.s32.totalorder %s29_s28, %s275_s9  ;;  %p281_p13 = scmp.lt.s32.totalorder %s275_s9, %s275_s9 }
  0x1f   :  { %p282_p0 = por %p281_p13, %p280_p12 }
  0x21   :  { %p283_p1 = pnand %p282_p0, %p276_p11 }
  0x23   :  { %286 = shalt.err (!%p283_p1)
}
  0x24   :  { %s319_s0 = smov 128   ;;  %s320_s10 = smov 8  }
  0x25   :  { %34 = dma.hbm_to_vmem [thread:$0]  %s391_s1, 2048, %s29_s28, [#allocation6], %s319_s0, %s319_s0, %s320_s10  }
  0x26   :  { %309 = dma.done.wait [#allocation3], 128  }
  0x27   :  { %310 = vsyncadd [#allocation3], 4294967168 }
  0x28   :  { %311 = dma.done.wait [#allocation6], 2048  }
  0x29   :  { %312 = vsyncadd [#allocation6], 4294965248  ;;  %v321_v0 = vmov 0.0|0.0   ;;  %vm322_vm0 = vmmov 0   ;;  %v323_v1 = vmov 0.0   ;;  %v44_v2 = vld [vmem:[#allocation5] sm:$0xff] }
  0x2a   :  { %209 = vmatprep.subr.bf16.mxu0 %v321_v0  ;;  %206 = vmatprep.mubr.msk.f32.mxu0 %vm322_vm0, %v323_v1  ;;  %v45_v3 = vld [vmem:[#allocation5 + $0x8] sm:$0xff]  ;;  %v46_v4 = vld [vmem:[#allocation5 + $0x10] sm:$0xff]  ;;  %v47_v6 = vld [vmem:[#allocation5 + $0x18] sm:$0xff] }
  0x2b   :  { %v210_v5 = vpack.c.bf16 %v45_v3, %v44_v2  ;;  %v213_v7 = vpack.c.bf16 %v47_v6, %v46_v4  ;;  %v48_v8 = vld [vmem:[#allocation5 + $0x20] sm:$0xff]  ;;  %v49_v9 = vld [vmem:[#allocation5 + $0x28] sm:$0xff]  ;;  %v50_v11 = vld [vmem:[#allocation5 + $0x30] sm:$0xff] }
  0x2c   :  { %v216_v10 = vpack.c.bf16 %v49_v9, %v48_v8  ;;  %v51_v12 = vld [vmem:[#allocation5 + $0x38] sm:$0xff]  ;;  %v52_v14 = vld [vmem:[#allocation5 + $0x40] sm:$0xff]  ;;  %v53_v15 = vld [vmem:[#allocation5 + $0x48] sm:$0xff] }
  0x2d   :  { %211 = vmatpush3.bf16.msra.mxu0 %v210_v5  ;;  %v219_v13 = vpack.c.bf16 %v51_v12, %v50_v11  ;;  %v222_v16 = vpack.c.bf16 %v53_v15, %v52_v14  ;;  %v54_v17 = vld [vmem:[#allocation5 + $0x50] sm:$0xff]  ;;  %v55_v18 = vld [vmem:[#allocation5 + $0x58] sm:$0xff]  ;;  %v56_v20 = vld [vmem:[#allocation5 + $0x60] sm:$0xff] }
  0x2e   :  { %212 = vmatprep.subr.bf16.mxu0 %v321_v0  ;;  %v225_v19 = vpack.c.bf16 %v55_v18, %v54_v17  ;;  %v57_v21 = vld [vmem:[#allocation5 + $0x68] sm:$0xff]  ;;  %v58_v23 = vld [vmem:[#allocation5 + $0x70] sm:$0xff]  ;;  %v59_v24 = vld [vmem:[#allocation5 + $0x78] sm:$0xff] }
  0x2f   :  { %v228_v22 = vpack.c.bf16 %v57_v21, %v56_v20  ;;  %v231_v25 = vpack.c.bf16 %v59_v24, %v58_v23  ;;  %v43_v26 = vld [vmem:[#allocation2] sm:$0xff] }
  0x30   :  { %v156_v27 = vld [vmem:[%s392_s2] ss:$0 sm:$0xff] }
  0x31   :  { %214 = vmatpush3.bf16.msra.mxu0 %v213_v7 }
  0x32   :  { %215 = vmatprep.subr.bf16.mxu0 %v321_v0 }
  0x35   :  { %217 = vmatpush3.bf16.msra.mxu0 %v216_v10 }
  0x36   :  { %218 = vmatprep.subr.bf16.mxu0 %v321_v0 }
  0x39   :  { %220 = vmatpush3.bf16.msra.mxu0 %v219_v13 }
  0x3a   :  { %221 = vmatprep.subr.bf16.mxu0 %v321_v0 }
  0x3d   :  { %223 = vmatpush3.bf16.msra.mxu0 %v222_v16 }
  0x3e   :  { %224 = vmatprep.subr.bf16.mxu0 %v321_v0 }
  0x41   :  { %226 = vmatpush3.bf16.msra.mxu0 %v225_v19 }
  0x42   :  { %227 = vmatprep.subr.bf16.mxu0 %v321_v0 }
  0x45   :  { %229 = vmatpush3.bf16.msra.mxu0 %v228_v22 }
  0x46   :  { %230 = vmatprep.subr.bf16.mxu0 %v321_v0 }
  0x49   :  { %232 = vmatpush3.bf16.msra.mxu0 %v231_v25 }
  0x4c   :  { %207 = vmatmul.mubr.f32.vlgmr.msra.gmra.mrb[0].mxu0 %v43_v26 }
 0x11f   :  { %v133_v28 = vpop.f32.mrb[0].mxu0 }
 0x120   :  { %v134_v29 = vadd.f32 %v156_v27, %v133_v28  ;;  %v208_v30 = vpop.f32.mrb[1].mxu0 }
 0x122   :  { %137 = vst [vmem:[#allocation7] sm:$0xff] %v134_v29 }
 0x123   :  { %142 = vsyncadd [#allocation4], 64  ;;  %s324_s14 = smov [#allocation7]  }
 0x124   :  { %s143_s15 = sshll.u32 %s324_s14, 4  ;;  %s144_s15 = int_to_ptr.vmem [resolvable:$true] %s143_s15 }
 0x125   :  { %s287_s16 = scalar_lea.vmem %s144_s15, 64  ;;  %s291_s17 = scalar_lea.vmem %s144_s15, 128 }
 0x126   :  { %p288_p2 = scmp.ne.s32.totalorder %s144_s15, %s287_s16  ;;  %p292_p3 = scmp.lt.s32.totalorder %s144_s15, %s144_s15 }
 0x127   :  { %p293_p4 = scmp.lt.s32.totalorder %s291_s17, %s287_s16 }
 0x129   :  { %p294_p5 = por %p293_p4, %p292_p3 }
 0x12b   :  { %p295_p6 = pnand %p294_p5, %p288_p2 }
 0x12d   :  { %298 = shalt.err (!%p295_p6)
}
 0x12e   :  { %s299_s2 = scalar_lea.hbm %s393_s3, 64 }
 0x12f   :  { %p300_p7 = scmp.ne.s32.totalorder %s393_s3, %s299_s2  ;;  %p303_p8 = scmp.lt.u32.totalorder %s299_s2, %s393_s3 }
 0x131   :  { %p305_p9 = pnand %p303_p8, %p300_p7 }
 0x133   :  { %308 = shalt.err (!%p305_p9)
}
 0x134   :  { %149 = dma.vmem_to_hbm [thread:$0]  %s144_s15, 64, %s393_s3, [#allocation4], %s316_s23, %s316_s23, %s317_s24  }
 0x135   :  { %313 = dma.done.wait [#allocation4], 128  }
 0x136   :  { %314 = vsyncadd [#allocation4], 4294967168 }
 0x137   :  { %153 = vsyncpa [#allocation3], 1 }
 0x138   :  { %154 = vsyncpa [#allocation6], 1 }
 0x139   :  { %155 = vsyncpa [#allocation4], 1 }

</bundles_post_ra>
